<compile_context>
chip_gen: v6e
topology: v6e:2x2x1
jax: 0.10.0
libtpu: 0.0.40
codegen_flags: <defaults>
</compile_context>

<pallas_src>
import functools

import jax
import jax.numpy as jnp
from jax.experimental import pallas as pl
from jax.experimental.pallas import tpu as pltpu

_EPS = 1e-6
# Row alignment that satisfies f32 (8), bf16 (16) and int8-mask (32) tiling.
_SUBLANE = 32


def _fake_quant_kernel(w_ref, mask_ref, o_ref, *, clamp_value):
    # (ROW_TILE, IN) tiles resident in VMEM. Compute in f32 regardless of the
    # storage dtype (v5e has no bf16 VPU; avoids double-rounding the scale).
    w = w_ref[...].astype(jnp.float32)
    # Prune: binary {0,1} mask shipped as int8 to cut HBM read traffic.
    w = jnp.where(mask_ref[...] != 0, w, 0.0)

    row_max = jnp.max(jnp.abs(w), axis=1, keepdims=True)      # (ROW_TILE, 1)
    # Per-row divide: negligible cost, kept exact to match the reference.
    scale = row_max / clamp_value + _EPS
    # Exact per-element divide kept for bit-exact parity with the reference
    # (approx reciprocal can flip values sitting on a .5 rounding boundary).
    quanted = w / scale
    # Cheaper than jnp.sign(q) * eps; identical result (round(+eps) == 0 at 0).
    nudge = jnp.where(quanted >= 0.0, _EPS, -_EPS)
    rounded = jnp.round(quanted + nudge)
    clamped = jnp.clip(rounded, -clamp_value, clamp_value)
    o_ref[...] = (clamped * scale).astype(o_ref.dtype)


def _choose_row_tile(out_f, in_f, itemsize, target_block_bytes=2 << 20):
    """Pick a row tile giving ~target_block_bytes per block, 32-row aligned."""
    if out_f <= _SUBLANE:
        # Full-extent block along rows is always a legal block shape.
        return int(out_f)
    rows = max(_SUBLANE, target_block_bytes // max(1, itemsize * in_f))
    rows = (rows // _SUBLANE) * _SUBLANE
    # Keep >= 2 grid steps when possible so v7x's two TensorCores both get work.
    half = (pl.cdiv(out_f, 2) // _SUBLANE) * _SUBLANE
    if half >= _SUBLANE:
        rows = min(rows, half)
    return int(max(_SUBLANE, rows))


def linear_weight_fake_quant(w, prune_mask, clamp_value=127.0, *,
                             row_tile=None, donate_weight=False):
    """Fake-quantize a Linear weight matrix [out_features, in_features]."""
    assert w.ndim == 2 and w.shape == prune_mask.shape
    out_f, in_f = w.shape
    itemsize = jnp.dtype(w.dtype).itemsize

    if row_tile is None:
        row_tile = _choose_row_tile(out_f, in_f, itemsize)
    grid = pl.cdiv(out_f, row_tile)  # padded last block is safe (per-row math)

    # Prune masks are binary {0,1}: ship as int8 (1/4 of the f32 mask traffic).
    mask_i8 = (prune_mask != 0).astype(jnp.int8)

    kernel = functools.partial(_fake_quant_kernel, clamp_value=float(clamp_value))

    # Scoped-VMEM budget: 2 pipeline buffers per stream (w, out in w.dtype;
    # mask in int8) + slack. Clipped so it always fits v7x's 64 MiB physical
    # VMEM while unlocking tiles bigger than the 16/32 MiB scoped defaults.
    block_elems = row_tile * in_f
    needed = 2 * block_elems * (2 * itemsize + 1) + (4 << 20)
    vmem_limit = int(min(max(needed, 16 << 20), 48 << 20))

    return pl.pallas_call(
        kernel,
        out_shape=jax.ShapeDtypeStruct((out_f, in_f), w.dtype),
        grid_spec=pltpu.PrefetchScalarGridSpec(
            num_scalar_prefetch=0,
            grid=(grid,),
            in_specs=[
                pl.BlockSpec((row_tile, in_f), lambda i: (i, 0)),
                pl.BlockSpec((row_tile, in_f), lambda i: (i, 0)),
            ],
            out_specs=pl.BlockSpec((row_tile, in_f), lambda i: (i, 0)),
        ),
        compiler_params=pltpu.CompilerParams(
            dimension_semantics=("parallel",),
            vmem_limit_bytes=vmem_limit,
        ),
        input_output_aliases={0: 0} if donate_weight else {},
    )(w, mask_i8)


def _reference(w, prune_mask, clamp_value=127.0):
    w = w * prune_mask
    row_max = jnp.max(jnp.abs(w), axis=1, keepdims=True)
    scale = row_max / clamp_value + _EPS
    q = w / scale
    r = jnp.round(q + jnp.sign(q) * _EPS)
    c = jnp.clip(r, -clamp_value, clamp_value)
    return c * scale


if __name__ == "__main__":
    key = jax.random.PRNGKey(0)
    k_w, k_m = jax.random.split(key)

    out_features, in_features = 64, 256
    w = jax.random.normal(k_w, (out_features, in_features), dtype=jnp.float32)
    # Deterministic binary prune mask (~50% sparsity).
    prune_mask = (
        jax.random.uniform(k_m, (out_features, in_features)) > 0.5
    ).astype(jnp.float32)

    out = linear_weight_fake_quant(w, prune_mask, clamp_value=127.0)
    out = jax.block_until_ready(out)

    ref = _reference(w, prune_mask, clamp_value=127.0)
    assert out.shape == (out_features, in_features)
    assert jnp.allclose(out, ref, atol=1e-5, rtol=1e-5)

    print("KERNEL_OK")
</pallas_src>

<mosaic_0001>
module attributes {stable_mosaic.version = 11 : i64} {
  func.func @_fake_quant_kernel(%arg0: i32, %arg1: memref<32x256xf32, #tpu.memory_space<vmem>>, %arg2: memref<32x256xi8, #tpu.memory_space<vmem>>, %arg3: memref<32x256xf32, #tpu.memory_space<vmem>>) attributes {dimension_semantics = [#tpu.dimension_semantics<parallel>], iteration_bounds = array<i64: 2>, scalar_prefetch = 0 : i64, scratch_operands = 0 : i64, tpu.core_type = #tpu.core_type<tc>, window_params = [{transform_indices = @transform_0, window_bounds = array<i64: 32, 256>}, {transform_indices = @transform_1, window_bounds = array<i64: 32, 256>}, {transform_indices = @transform_2, window_bounds = array<i64: 32, 256>}]} {
    %c0 = arith.constant 0 : index
    %c0_0 = arith.constant 0 : index
    %0 = vector.load %arg1[%c0, %c0_0] : memref<32x256xf32, #tpu.memory_space<vmem>>, vector<32x256xf32>
    %c0_1 = arith.constant 0 : index
    %c0_2 = arith.constant 0 : index
    %1 = vector.load %arg2[%c0_1, %c0_2] : memref<32x256xi8, #tpu.memory_space<vmem>>, vector<32x256xi8>
    %c0_i8 = arith.constant 0 : i8
    %2 = vector.broadcast %c0_i8 : i8 to vector<32x256xi8>
    %3 = arith.cmpi ne, %1, %2 : vector<32x256xi8>
    %cst = arith.constant 0.000000e+00 : f32
    %4 = vector.broadcast %cst : f32 to vector<32x256xf32>
    %5 = arith.select %3, %0, %4 : vector<32x256xi1>, vector<32x256xf32>
    %6 = math.absf %5 : vector<32x256xf32>
    %cst_3 = arith.constant dense<0xFF800000> : vector<32xf32>
    %7 = vector.multi_reduction <maximumf>, %6, %cst_3 [1] : vector<32x256xf32> to vector<32xf32>
    %8 = vector.shape_cast %7 : vector<32xf32> to vector<32x1xf32>
    %cst_4 = arith.constant 1.270000e+02 : f32
    %9 = vector.broadcast %cst_4 : f32 to vector<32x1xf32>
    %10 = arith.divf %8, %9 : vector<32x1xf32>
    %cst_5 = arith.constant 9.99999997E-7 : f32
    %11 = vector.broadcast %cst_5 : f32 to vector<32x1xf32>
    %12 = arith.addf %10, %11 : vector<32x1xf32>
    %13 = vector.broadcast %12 : vector<32x1xf32> to vector<32x256xf32>
    %14 = arith.divf %5, %13 : vector<32x256xf32>
    %cst_6 = arith.constant 0.000000e+00 : f32
    %15 = vector.broadcast %cst_6 : f32 to vector<32x256xf32>
    %16 = arith.cmpf oge, %14, %15 : vector<32x256xf32>
    %cst_7 = arith.constant 9.99999997E-7 : f32
    %cst_8 = arith.constant -9.99999997E-7 : f32
    %17 = vector.broadcast %cst_7 : f32 to vector<32x256xf32>
    %18 = vector.broadcast %cst_8 : f32 to vector<32x256xf32>
    %19 = arith.select %16, %17, %18 : vector<32x256xi1>, vector<32x256xf32>
    %20 = arith.addf %14, %19 : vector<32x256xf32>
    %21 = math.roundeven %20 : vector<32x256xf32>
    %cst_9 = arith.constant -1.270000e+02 : f32
    %cst_10 = arith.constant 1.270000e+02 : f32
    %22 = vector.broadcast %cst_9 : f32 to vector<32x256xf32>
    %23 = arith.maximumf %22, %21 : vector<32x256xf32>
    %24 = vector.broadcast %cst_10 : f32 to vector<32x256xf32>
    %25 = arith.minimumf %24, %23 : vector<32x256xf32>
    %26 = vector.broadcast %12 : vector<32x1xf32> to vector<32x256xf32>
    %27 = arith.mulf %25, %26 : vector<32x256xf32>
    %c0_11 = arith.constant 0 : index
    %c0_12 = arith.constant 0 : index
    %28 = vector.load %arg3[%c0_11, %c0_12] : memref<32x256xf32, #tpu.memory_space<vmem>>, vector<32x256xf32>
    tpu.vector_store %arg3[%c0_11, %c0_12], %27 {strides = array<i32>} : memref<32x256xf32, #tpu.memory_space<vmem>>, vector<32x256xf32>,
    return
  }
  func.func @transform_0(%arg0: i32) -> (i32, i32) {
    %c0_i32 = arith.constant 0 : i32
    %c0_i32_0 = arith.constant 0 : i32
    return %arg0, %c0_i32 : i32, i32
  }
  func.func @transform_1(%arg0: i32) -> (i32, i32) {
    %c0_i32 = arith.constant 0 : i32
    %c0_i32_0 = arith.constant 0 : i32
    return %arg0, %c0_i32 : i32, i32
  }
  func.func @transform_2(%arg0: i32) -> (i32, i32) {
    %c0_i32 = arith.constant 0 : i32
    %c0_i32_0 = arith.constant 0 : i32
    return %arg0, %c0_i32 : i32, i32
  }
}

</mosaic_0001>

<bundles_post_ra>
// kernel: tpu_custom_call.1
= control target key start
LH: loop header
LB: loop body
LE: loop exit
PB: predicated region body
PF: predicated region fallthrough
CT: control target
= control target key end

     0   :  { %7 = vsyncpa [#allocation3], 0  ;;  %s1069_s0 = inlined_call_operand.hbm [shape: f32[64,256], index: 0, kind: input, shape index: {}]   ;;  %s1070_s1 = inlined_call_operand.hbm [shape: s8[64,256], index: 1, kind: input, shape index: {}]   ;;  %s1071_s2 = inlined_call_operand.hbm [shape: f32[64,256], index: 2, kind: output, shape index: {}]  }
   0x1   :  { %9 = vsyncpa [#allocation3 + $0x1], 0 }
   0x2   :  { %10 = vsyncpa [#allocation6], 0 }
   0x3   :  { %12 = vsyncpa [#allocation6 + $0x1], 0 }
   0x4   :  { %13 = vsyncpa [#allocation4], 0 }
   0x5   :  { %15 = vsyncpa [#allocation4 + $0x1], 0  ;;  %s795_s9 = smov 0   ;;  %s797_s10 = smov 0  }
   0x6   :  { %s799_s11 = smov 0   ;;  %s801_s12 = smov 0  }
   0x7 LB: > { %s816_s13 = sadd.s32 4294967295, %s769_s12   ;;  %s483_s14 = sadd.s32 4294967294, %s769_s12   ;;  %s769_s12 = sphi %s801_s12, %s1094_s12   ;;  %s765_s11 = sphi %s799_s11, %s1093_s11   ;;  %s761_s10 = sphi %s797_s10, %s1092_s10   ;;  %s757_s9 = sphi %s795_s9, %s1091_s9  }
   0x8   : > { %s820_s15 = sadd.s32 1, %s769_s12   ;;  %s28_s16 = sadd.s32 1, %s765_s11 }
   0x9   : > { %s25_s17 = ssub.s32 %s769_s12, %s820_s15  ;;  %p35_p0 = scmp.ne.s32.totalorder %s765_s11, %s761_s10 }
   0xa   : > { %p26_p1 = scmp.eq.s32.totalorder %s25_s17, 0  ;;  %p36_p2 = scmp.eq.s32.totalorder %s769_s12, 0 }
   0xb   : > { %p41_p3 = scmp.ne.s32.totalorder %s761_s10, %s757_s9  ;;  %p42_p4 = scmp.eq.s32.totalorder %s816_s13, 0 }
   0xc   : > { %s832_s18 = scalar_select %p26_p1, %s765_s11, %s28_s16  }
   0xd   : > { %p834_p5 = por %p36_p2, %p35_p0  ;;  %p838_p6 = por %p42_p4, %p41_p3 }
   0xe   : > { %p91_p7 = scmp.eq.s32.totalorder %s816_s13, 1  ;;  %p97_p8 = scmp.eq.s32.totalorder %s483_s14, 1 }
   0xf   : > { %s1075_s20 = scalar_select %p838_p6, 1, 0 }
  0x10   : > { %p597_p10 = scmp.lt.s32.totalorder %s769_s12, 2  ;;  %p845_p11 = por %p91_p7, %p35_p0 }
  0x11   : > { %p849_p12 = por %p97_p8, %p41_p3  ;;  %s854_s23 = sand.u32 1, %s765_s11  }
  0x12   : > { %s1076_s21 = scalar_select %p845_p11, 1, 0 }
  0x13   : > { %s1077_s22 = scalar_select %p849_p12, 1, 0 }
  0x14   : > { %s512_s24 = sshll.u32 %s769_s12, 10  ;;  %s486_s25 = sshll.u32 %s854_s23, 6 }
  0x15   : > { %s861_s28 = scalar_lea.hbm %s1069_s0, %s512_s24  ;;  %s121_s29 = scalar_lea.vmem [#allocation2], %s486_s25 }
  0x16   : > { %s129_s30 = sshll.u32 %s121_s29, 4  ;;  %p865_p13 = pnand %p597_p10, %p834_p5  ;;  %s869_s30 = int_to_ptr.vmem [resolvable:$true] %s129_s30 }
  0x17   : > { %s118_s4 = scalar_lea.sflag [#allocation3], %s854_s23  ;;  %s645_s5 = scalar_lea.hbm %s861_s28, 1024 }
  0x18   : > { %p646_p0 = scmp.ne.s32.totalorder %s861_s28, %s645_s5  ;;  %p647_p1 = pneg %p865_p13 }
  0x19   : > { %s650_s8 = scalar_lea.hbm %s1069_s0, 2048  ;;  %p651_p4 = scmp.lt.s32.totalorder %s861_s28, %s1069_s0 }
  0x1a   : > { %p648_p2 = pnand %p647_p1, %p646_p0  ;;  %p652_p5 = scmp.lt.s32.totalorder %s650_s8, %s645_s5 }
  0x1c   : > { %p649_p3 = pneg %p648_p2  ;;  %p653_p7 = por %p652_p5, %p651_p4 }
  0x1e   : > { %p654_p8 = pnand %p653_p7, %p649_p3 }
  0x20   : > { %657 = shalt.err (!%p654_p8)
}
  0x21   : > { %s658_s17 = scalar_lea.vmem %s869_s30, 1024  ;;  %s771_s19 = smov [#allocation2]  }
  0x22   : > { %p659_p10 = scmp.ne.s32.totalorder %s869_s30, %s658_s17  ;;  %s663_s24 = sshll.u32 %s771_s19, 4  ;;  %s664_s24 = int_to_ptr.vmem [resolvable:$false] %s663_s24 }
  0x23   : > { %s665_s25 = scalar_lea.vmem %s664_s24, 2048  ;;  %p666_p9 = scmp.lt.s32.totalorder %s869_s30, %s664_s24 }
  0x24   : > { %p661_p0 = pnand %p659_p10, %p647_p1  ;;  %p667_p12 = scmp.lt.s32.totalorder %s665_s25, %s658_s17 }
  0x26   : > { %p662_p2 = pneg %p661_p0  ;;  %p668_p11 = por %p667_p12, %p666_p9 }
  0x28   : > { %p669_p4 = pnand %p668_p11, %p662_p2 }
  0x2a   : > { %672 = shalt.err (!%p669_p4)
}
  0x2b   : > { %s772_s26 = smov 256   ;;  %s773_s27 = smov 16  }
  0x2c   : > { %589 = dma.hbm_to_vmem [thread:$0]  (!%p865_p13), %s861_s28, 1024, %s869_s30, %s118_s4, %s772_s26, %s772_s26, %s773_s27  }
  0x2d   : > { %p493_p3 = scmp.ge.s32.totalorder %s769_s12, 1  ;;  %p156_p5 = scmp.lt.s32.totalorder %s769_s12, 3 }
  0x2e   : > { %s490_s29 = sshll.u32 %s854_s23, 4  ;;  %s513_s6 = sshll.u32 %s769_s12, 8 }
  0x2f   : > { %p901_p9 = pnand %p493_p3, %p156_p5  ;;  %s143_s7 = scalar_lea.vmem [#allocation5], %s490_s29 }
  0x30   : > { %s151_s8 = sshll.u32 %s143_s7, 4  ;;  %s149_s17 = scalar_lea.hbm %s1070_s1, %s513_s6  ;;  %s152_s8 = int_to_ptr.vmem [resolvable:$true] %s151_s8 }
  0x31   : > { %s1079_s5 = scalar_select %p901_p9, 1, 0 }
  0x32   : > { %s140_s19 = scalar_lea.sflag [#allocation6], %s854_s23  ;;  %s673_s24 = scalar_lea.hbm %s149_s17, 256 }
  0x33   : > { %p674_p11 = scmp.ne.s32.totalorder %s149_s17, %s673_s24  ;;  %s678_s4 = scalar_lea.hbm %s1070_s1, 512 }
  0x34   : > { %p679_p8 = scmp.lt.s32.totalorder %s149_s17, %s1070_s1  ;;  %p680_p10 = scmp.lt.s32.totalorder %s678_s4, %s673_s24 }
  0x35   : > { %p676_p12 = pnand %p674_p11, %p647_p1 }
  0x36   : > { %p681_p0 = por %p680_p10, %p679_p8 }
  0x37   : > { %p677_p7 = pneg %p676_p12 }
  0x39   : > { %p682_p2 = pnand %p681_p0, %p677_p7 }
  0x3b   : > { %685 = shalt.err (!%p682_p2)
}
  0x3c   : > { %s686_s27 = scalar_lea.vmem %s152_s8, 256  ;;  %s774_s23 = smov [#allocation5]  }
  0x3d   : > { %p687_p4 = scmp.ne.s32.totalorder %s152_s8, %s686_s27  ;;  %s691_s29 = sshll.u32 %s774_s23, 4  ;;  %s692_s29 = int_to_ptr.vmem [resolvable:$false] %s691_s29 }
  0x3e   : > { %s693_s6 = scalar_lea.vmem %s692_s29, 512  ;;  %p694_p11 = scmp.lt.s32.totalorder %s152_s8, %s692_s29 }
  0x3f   : > { %p689_p3 = pnand %p687_p4, %p647_p1  ;;  %p695_p12 = scmp.lt.s32.totalorder %s693_s6, %s686_s27 }
  0x41   : > { %p690_p5 = pneg %p689_p3  ;;  %p696_p6 = por %p695_p12, %p694_p11 }
  0x43   : > { %p697_p9 = pnand %p696_p6, %p690_p5 }
  0x45   : > { %700 = shalt.err (!%p697_p9)
}
  0x46   : > { %592 = dma.hbm_to_vmem [thread:$0]  (!%p865_p13), %s149_s17, 256, %s152_s8, %s140_s19  }
  0x47   : > { %p1080_p7 = scmp.ne.s32.totalorder %s1079_s5, 0 }
  0x48   : > { %s927_s7 = sand.u32 (!%p1080_p7), 1, %s761_s10   ;;  %p1081_p6 = scmp.ne.s32.totalorder (!%p1080_p7), %s1075_s20, 0 }
  0x49   : > { %160 = sbr.rel (%p1080_p7) target bundleno = 307 (0x133), region = 28  ;;  %s494_s14 = sshll.u32 (!%p1080_p7), %s927_s7, 6 }
  0x4a   : > { %s163_s16 = scalar_lea.sflag (!%p1080_p7), [#allocation3], %s927_s7  ;;  %s933_s24 = scalar_lea.vmem (!%p1080_p7), [#allocation2], %s494_s14 }
  0x4e   : > { %744 = dma.done.wait (%p1081_p6), %s163_s16, 1024  }
  0x4f   : > { %746 = vsyncadd (%p1081_p6), %s163_s16, 4294966272  ;;  %s495_s3 = sshll.u32 %s927_s7, 4  ;;  %s172_s5 = scalar_lea.sflag [#allocation6], %s927_s7 }
  0x50   : > { %s175_s8 = scalar_lea.vmem [#allocation5], %s495_s3 }
  0x51   : > { %748 = dma.done.wait (%p1081_p6), %s172_s5, 256  }
  0x52   : > { %750 = vsyncadd (%p1081_p6), %s172_s5, 4294967040  ;;  %v213_v0 = vld [vmem:[%s175_s8] sm:$0xff]  ;;  %v214_v1 = vld [vmem:[%s175_s8 + $0x8] sm:$0xff]  ;;  %v775_v2 = vmov 0   ;;  %s1002_s20 = scalar_lea.vmem [#allocation7], %s494_s14  ;;  %s515_s17 = sshll.u32 %s816_s13, 10 }
  0x53   : > { %vm215_vm0 = vnez %v213_v0  ;;  %vm216_vm1 = vnez %v214_v1  ;;  %v209_v21 = vld [vmem:[%s933_s24 + $0x20] sm:$0xff]  ;;  %v210_v25 = vld [vmem:[%s933_s24 + $0x28] sm:$0xff]  ;;  %v211_v39 = vld [vmem:[%s933_s24 + $0x30] sm:$0xff]  ;;  %s387_s19 = sshll.u32 %s1002_s20, 4  ;;  %s1021_s4 = scalar_lea.hbm %s1071_s2, %s515_s17  ;;  %s1023_s19 = int_to_ptr.vmem [resolvable:$true] %s387_s19 }
  0x54   : > { %v217_v3 = vsel %vm215_vm0, 16843009, %v775_v2  ;;  %v218_v4 = vsel %vm216_vm1, 16843009, %v775_v2  ;;  %v205_v28 = vld [vmem:[%s933_s24] sm:$0xff]  ;;  %v206_v29 = vld [vmem:[%s933_s24 + $0x8] sm:$0xff] }
  0x55   : > { %v223_v5 = vunpack.c.2.s8 %v217_v3  ;;  %v219_v6 = vunpack.c.0.s8 %v217_v3  ;;  %v225_v7 = vunpack.c.3.s8 %v217_v3  ;;  %v224_v8 = vunpack.c.2.s8 %v218_v4  ;;  %v212_v40 = vld [vmem:[%s933_s24 + $0x38] sm:$0xff]  ;;  %v207_v46 = vld [vmem:[%s933_s24 + $0x10] sm:$0xff]  ;;  %s373_s13 = scalar_lea.sflag [#allocation4], %s927_s7  ;;  %s701_s25 = scalar_lea.vmem %s1023_s19, 1024 }
  0x56   : > { %v220_v9 = vunpack.c.0.s8 %v218_v4  ;;  %v226_v10 = vunpack.c.3.s8 %v218_v4  ;;  %v221_v11 = vunpack.c.1.s8 %v217_v3  ;;  %v222_v12 = vunpack.c.1.s8 %v218_v4  ;;  %v208_v47 = vld [vmem:[%s933_s24 + $0x18] sm:$0xff]  ;;  %p702_p13 = scmp.ne.s32.totalorder %s1023_s19, %s701_s25  ;;  %p1088_p1 = scmp.ne.s32.totalorder %s1076_s21, 0 }
  0x57   : > { %v231_v13 = vpack.c.b16 %v224_v8, %v223_v5  ;;  %s777_s26 = smov [#allocation7]  }
  0x58   : > { %v227_v14 = vpack.c.b16 %v220_v9, %v219_v6  ;;  %v233_v15 = vpack.c.b16 %v226_v10, %v225_v7  ;;  %v229_v16 = vpack.c.b16 %v222_v12, %v221_v11  ;;  %p703_p9 = pnand %p702_p13, %p1088_p1  ;;  %s705_s27 = sshll.u32 %s777_s26, 4  ;;  %s706_s27 = int_to_ptr.vmem [resolvable:$false] %s705_s27 }
  0x59   : > { %v232_v17 = vpack.c.b8 %v231_v13, %v231_v13  ;;  %s707_s23 = scalar_lea.vmem %s706_s27, 2048  ;;  %p708_p10 = scmp.lt.s32.totalorder %s1023_s19, %s706_s27 }
  0x5a   : > { %v228_v18 = vpack.c.b8 %v227_v14, %v227_v14  ;;  %v234_v19 = vpack.c.b8 %v233_v15, %v233_v15  ;;  %v230_v20 = vpack.c.b8 %v229_v16, %v229_v16  ;;  %v776_v16 = vmov -1e-06   ;;  %p704_p8 = pneg %p703_p9  ;;  %p709_p0 = scmp.lt.s32.totalorder %s707_s23, %s701_s25 }
  0x5b   : > { %vm237_vm2 = vnez %v232_v17 }
  0x5c   : > { %vm235_vm3 = vnez %v228_v18  ;;  %vm238_vm4 = vnez %v234_v19  ;;  %v241_v22 = vsel %vm237_vm2, 16843009, %v775_v2  ;;  %vm236_vm5 = vnez %v230_v20  ;;  %p710_p2 = por %p709_p0, %p708_p10 }
  0x5d   : > { %v239_v23 = vsel %vm235_vm3, 16843009, %v775_v2  ;;  %v242_v24 = vsel %vm238_vm4, 16843009, %v775_v2  ;;  %v247_v26 = vunpack.c.0.s8 %v241_v22  ;;  %v248_v27 = vunpack.c.1.s8 %v241_v22 }
  0x5e   : > { %v243_v30 = vunpack.c.0.s8 %v239_v23  ;;  %v244_v31 = vunpack.c.1.s8 %v239_v23  ;;  %v249_v32 = vunpack.c.0.s8 %v242_v24  ;;  %v250_v33 = vunpack.c.1.s8 %v242_v24  ;;  %p711_p4 = pnand %p710_p2, %p704_p8 }
  0x5f   : > { %v240_v34 = vsel %vm236_vm5, 16843009, %v775_v2  ;;  %vm255_vm6 = vcmp.ne.s32.totalorder %v247_v26, 0  ;;  %vm256_vm7 = vcmp.ne.s32.totalorder %v248_v27, 0 }
  0x60   : > { %vm251_vm8 = vcmp.ne.s32.totalorder %v243_v30, 0  ;;  %vm252_vm9 = vcmp.ne.s32.totalorder %v244_v31, 0  ;;  %v263_v35 = vsel %vm255_vm6, %v209_v21, 0.0  ;;  %v264_v36 = vsel %vm256_vm7, %v210_v25, 0.0 }
  0x61   : > { %v259_v37 = vsel %vm251_vm8, %v205_v28, 0.0  ;;  %v260_v38 = vsel %vm252_vm9, %v206_v29, 0.0  ;;  %v271_v41 = vand.u32 2147483647, %v263_v35  ;;  %v272_v42 = vand.u32 2147483647, %v264_v36 }
  0x62   : > { %v267_v43 = vand.u32 2147483647, %v259_v37  ;;  %v245_v44 = vunpack.c.0.s8 %v240_v34  ;;  %v268_v45 = vand.u32 2147483647, %v260_v38  ;;  %vm257_vm10 = vcmp.ne.s32.totalorder %v249_v32, 0 }
  0x63   : > { %vm258_vm11 = vcmp.ne.s32.totalorder %v250_v33, 0  ;;  %v246_v48 = vunpack.c.1.s8 %v240_v34  ;;  %v281_v49 = vmax.f32.f32 %v271_v41, %v272_v42  ;;  %v265_v50 = vsel %vm257_vm10, %v211_v39, 0.0 }
  0x64   : > { %v266_v51 = vsel %vm258_vm11, %v212_v40, 0.0  ;;  %vm253_vm12 = vcmp.ne.s32.totalorder %v245_v44, 0  ;;  %v275_v52 = vmax.f32.f32 %v267_v43, %v268_v45  ;;  %v273_v53 = vand.u32 2147483647, %v265_v50 }
  0x65   : > { %v274_v54 = vand.u32 2147483647, %v266_v51  ;;  %vm254_vm13 = vcmp.ne.s32.totalorder %v246_v48, 0  ;;  %282 = vmax.xlane.f32.xlu1 %v281_v49  ;;  %v953_v55 = vsel %vm253_vm12, %v207_v46, 0.0 }
  0x66   : > { %v955_v56 = vsel %vm254_vm13, %v208_v47, 0.0  ;;  %276 = vmax.xlane.f32.xlu0 %v275_v52  ;;  %v269_v58 = vand.u32 2147483647, %v953_v55 }
  0x67   : > { %v284_v57 = vmax.f32.f32 %v273_v53, %v274_v54  ;;  %v270_v59 = vand.u32 2147483647, %v955_v56 }
  0x69   : > { %v278_v60 = vmax.f32.f32 %v269_v58, %v270_v59  ;;  %285 = vmax.xlane.f32.xlu1 %v284_v57 }
  0x6b   : > { %279 = vmax.xlane.f32.xlu0 %v278_v60 }
  0xee   : > { %v283_v61 = vpop.xlane.xlu1 %282 }
  0xef   : > { %v290_v62 = vmul.f32 0.007874016, %v283_v61  ;;  %v277_v63 = vpop.xlane.xlu0 %276 }
  0xf0   : > { %v288_v0 = vmul.f32 0.007874016, %v277_v63 }
  0xf1   : > { %v959_v1 = vadd.f32 1e-06, %v290_v62 }
  0xf2   : > { %v961_v2 = vadd.f32 1e-06, %v288_v0  ;;  %v286_v3 = vpop.xlane.xlu1 %285 }
  0xf3   : > { %637 = vrcp.f32 %v959_v1  ;;  %v291_v4 = vmul.f32 0.007874016, %v286_v3 }
  0xf4   : > { %639 = vrcp.f32 %v961_v2  ;;  %v280_v5 = vpop.xlane.xlu0 %279 }
  0xf5   : > { %v965_v6 = vadd.f32 1e-06, %v291_v4  ;;  %v289_v7 = vmul.f32 0.007874016, %v280_v5 }
  0xf7   : > { %641 = vrcp.f32 %v965_v6  ;;  %v968_v8 = vadd.f32 1e-06, %v289_v7 }
  0xf9   : > { %643 = vrcp.f32 %v968_v8 }
 0x100   : > { %v638_v9 = vpop.eup %637 }
 0x101   : > { %v640_v10 = vpop.eup %639  ;;  %v303_v11 = vmul.f32 %v638_v9, %v263_v35  ;;  %v304_v12 = vmul.f32 %v638_v9, %v264_v36 }
 0x102   : > { %v297_v13 = vmul.f32 %v640_v10, %v259_v37  ;;  %v298_v14 = vmul.f32 %v640_v10, %v260_v38 }
 0x103   : > { %vm312_vm14 = vcmp.ge.f32.partialorder %v303_v11, 0.0  ;;  %vm313_vm15 = vcmp.ge.f32.partialorder %v304_v12, 0.0 }
 0x104   : > { %v642_v15 = vpop.eup %641  ;;  %v320_v17 = vsel %vm312_vm14, 1e-06, %v776_v16  ;;  %v321_v18 = vsel %vm313_vm15, 1e-06, %v776_v16  ;;  %vm308_vm0 = vcmp.ge.f32.partialorder %v297_v13, 0.0  ;;  %vm309_vm1 = vcmp.ge.f32.partialorder %v298_v14, 0.0 }
 0x105   : > { %v328_v19 = vadd.f32 %v320_v17, %v303_v11  ;;  %v329_v20 = vadd.f32 %v321_v18, %v304_v12  ;;  %v316_v21 = vsel %vm308_vm0, 1e-06, %v776_v16  ;;  %v317_v22 = vsel %vm309_vm1, 1e-06, %v776_v16 }
 0x106   : > { %v324_v23 = vadd.f32 %v316_v21, %v297_v13  ;;  %v325_v24 = vadd.f32 %v317_v22, %v298_v14  ;;  %v306_v28 = vmul.f32 %v642_v15, %v265_v50  ;;  %v307_v32 = vmul.f32 %v642_v15, %v266_v51  ;;  %v644_v44 = vpop.eup %643 }
 0x107   : > { %v548_v25 = vand.u32 2147483647, %v328_v19  ;;  %v550_v26 = vcvt.f32.s32 %v328_v19  ;;  %v556_v27 = vand.u32 2147483647, %v329_v20  ;;  %v558_v29 = vcvt.f32.s32 %v329_v20 }
 0x108   : > { %v516_v30 = vand.u32 2147483647, %v324_v23  ;;  %v518_v31 = vcvt.f32.s32 %v324_v23  ;;  %v553_v35 = vand.u32 2147483648, %v328_v19  ;;  %v561_v36 = vand.u32 2147483648, %v329_v20 }
 0x109   : > { %vm975_vm2 = vcmp.lt.f32.partialorder %v548_v25, 8388608.0  ;;  %v551_v34 = vcvt.s32.f32 %v550_v26  ;;  %vm979_vm3 = vcmp.lt.f32.partialorder %v556_v27, 8388608.0  ;;  %v559_v38 = vcvt.s32.f32 %v558_v29 }
 0x10a   : > { %v519_v39 = vcvt.s32.f32 %v518_v31  ;;  %v521_v40 = vand.u32 2147483648, %v324_v23  ;;  %v524_v42 = vand.u32 2147483647, %v325_v24  ;;  %v526_v43 = vcvt.f32.s32 %v325_v24 }
 0x10b   : > { %v552_v41 = vand.u32 2147483647, %v551_v34  ;;  %vm314_vm4 = vcmp.ge.f32.partialorder %v306_v28, 0.0  ;;  %v560_v45 = vand.u32 2147483647, %v559_v38  ;;  %vm983_vm5 = vcmp.lt.f32.partialorder %v516_v30, 8388608.0 }
 0x10c   : > { %v520_v47 = vand.u32 2147483647, %v519_v39  ;;  %vm315_vm6 = vcmp.ge.f32.partialorder %v307_v32, 0.0  ;;  %v527_v49 = vcvt.s32.f32 %v526_v43  ;;  %v322_v50 = vsel %vm314_vm4, 1e-06, %v776_v16 }
 0x10d   : > { %v554_v48 = vor.u32 %v553_v35, %v552_v41  ;;  %v323_v51 = vsel %vm315_vm6, 1e-06, %v776_v16  ;;  %v562_v52 = vor.u32 %v561_v36, %v560_v45  ;;  %v529_v54 = vand.u32 2147483648, %v325_v24 }
 0x10e   : > { %v522_v53 = vor.u32 %v521_v40, %v520_v47  ;;  %v330_v57 = vadd.f32 %v322_v50, %v306_v28  ;;  %v528_v59 = vand.u32 2147483647, %v527_v49  ;;  %v331_v60 = vadd.f32 %v323_v51, %v307_v32 }
 0x10f   : > { %v555_v58 = vsel %vm975_vm2, %v554_v48, %v328_v19  ;;  %v300_v61 = vmul.f32 %v644_v44, %v953_v55  ;;  %v563_v62 = vsel %vm979_vm3, %v562_v52, %v329_v20  ;;  %v301_v3 = vmul.f32 %v644_v44, %v955_v56 }
 0x110   : > { %v501_v63 = vclamps-f32 %v555_v58, 127.0  ;;  %v523_v0 = vsel %vm983_vm5, %v522_v53, %v324_v23  ;;  %v502_v4 = vclamps-f32 %v563_v62, 127.0  ;;  %v530_v5 = vor.u32 %v529_v54, %v528_v59 }
 0x111   : > { %v497_v7 = vclamps-f32 %v523_v0, 127.0  ;;  %v566_v9 = vcvt.f32.s32 %v330_v57  ;;  %vm525_vm7 = vcmp.lt.f32.partialorder %v524_v42, 8388608.0  ;;  %v564_v14 = vand.u32 2147483647, %v330_v57 }
 0x112   : > { %v360_v10 = vmul.f32 %v501_v63, %v959_v1  ;;  %v361_v11 = vmul.f32 %v502_v4, %v959_v1  ;;  %v531_v12 = vsel %vm525_vm7, %v530_v5, %v325_v24  ;;  %v574_v15 = vcvt.f32.s32 %v331_v60 }
 0x113   : > { %v356_v55 = vmul.f32 %v497_v7, %v961_v2  ;;  %v567_v13 = vcvt.s32.f32 %v566_v9  ;;  %v498_v56 = vclamps-f32 %v531_v12, 127.0  ;;  %v569_v18 = vand.u32 2147483648, %v330_v57 }
 0x114   : > { %368 = vst [vmem:[%s1002_s20 + $0x20] sm:$0xff] %v360_v10  ;;  %369 = vst [vmem:[%s1002_s20 + $0x28] sm:$0xff] %v361_v11  ;;  %vm310_vm8 = vcmp.ge.f32.partialorder %v300_v61, 0.0  ;;  %vm311_vm9 = vcmp.ge.f32.partialorder %v301_v3, 0.0  ;;  %v575_v19 = vcvt.s32.f32 %v574_v15  ;;  %v572_v23 = vand.u32 2147483647, %v331_v60 }
 0x115   : > { %364 = vst [vmem:[%s1002_s20] sm:$0xff] %v356_v55  ;;  %v568_v17 = vand.u32 2147483647, %v567_v13  ;;  %v357_v1 = vmul.f32 %v498_v56, %v961_v2  ;;  %v318_v20 = vsel %vm310_vm8, 1e-06, %v776_v16  ;;  %v319_v21 = vsel %vm311_vm9, 1e-06, %v776_v16 }
 0x116   : > { %v326_v24 = vadd.f32 %v318_v20, %v300_v61  ;;  %v327_v25 = vadd.f32 %v319_v21, %v301_v3  ;;  %vm565_vm10 = vcmp.lt.f32.partialorder %v564_v14, 8388608.0  ;;  %v576_v26 = vand.u32 2147483647, %v575_v19 }
 0x117   : > { %v570_v22 = vor.u32 %v569_v18, %v568_v17  ;;  %365 = vst [vmem:[%s1002_s20 + $0x8] sm:$0xff] %v357_v1  ;;  %v577_v27 = vand.u32 2147483648, %v331_v60  ;;  %vm573_vm11 = vcmp.lt.f32.partialorder %v572_v23, 8388608.0 }
 0x118   : > { %v534_v29 = vcvt.f32.s32 %v326_v24  ;;  %v542_v32 = vcvt.f32.s32 %v327_v25  ;;  %v532_v34 = vand.u32 2147483647, %v326_v24  ;;  %v537_v38 = vand.u32 2147483648, %v326_v24 }
 0x119   : > { %v571_v28 = vsel %vm565_vm10, %v570_v22, %v330_v57  ;;  %v578_v30 = vor.u32 %v577_v27, %v576_v26  ;;  %v540_v39 = vand.u32 2147483647, %v327_v25  ;;  %v545_v41 = vand.u32 2147483648, %v327_v25 }
 0x11a   : > { %v503_v31 = vclamps-f32 %v571_v28, 127.0  ;;  %v535_v2 = vcvt.s32.f32 %v534_v29  ;;  %v543_v35 = vcvt.s32.f32 %v542_v32  ;;  %vm533_vm12 = vcmp.lt.f32.partialorder %v532_v34, 8388608.0 }
 0x11b   : > { %v579_v33 = vsel %vm573_vm11, %v578_v30, %v331_v60  ;;  %vm541_vm13 = vcmp.lt.f32.partialorder %v540_v39, 8388608.0 }
 0x11c   : > { %v362_v16 = vmul.f32 %v503_v31, %v965_v6  ;;  %v504_v36 = vclamps-f32 %v579_v33, 127.0  ;;  %v536_v37 = vand.u32 2147483647, %v535_v2  ;;  %v544_v40 = vand.u32 2147483647, %v543_v35 }
 0x11e   : > { %370 = vst [vmem:[%s1002_s20 + $0x30] sm:$0xff] %v362_v16  ;;  %v363_v42 = vmul.f32 %v504_v36, %v965_v6  ;;  %v538_v43 = vor.u32 %v537_v38, %v536_v37  ;;  %v546_v44 = vor.u32 %v545_v41, %v544_v40 }
 0x120   : > { %371 = vst [vmem:[%s1002_s20 + $0x38] sm:$0xff] %v363_v42  ;;  %v539_v45 = vsel %vm533_vm12, %v538_v43, %v326_v24  ;;  %v547_v46 = vsel %vm541_vm13, %v546_v44, %v327_v25 }
 0x121   : > { %v499_v47 = vclamps-f32 %v539_v45, 127.0  ;;  %v500_v48 = vclamps-f32 %v547_v46, 127.0 }
 0x123   : > { %v358_v49 = vmul.f32 %v499_v47, %v968_v8  ;;  %v359_v6 = vmul.f32 %v500_v48, %v968_v8 }
 0x125   : > { %366 = vst [vmem:[%s1002_s20 + $0x10] sm:$0xff] %v358_v49  ;;  %367 = vst [vmem:[%s1002_s20 + $0x18] sm:$0xff] %v359_v6 }
 0x126   : > { %714 = shalt.err (!%p711_p4)
}
 0x127   : > { %s715_s29 = scalar_lea.hbm %s1021_s4, 1024  ;;  %s719_s16 = scalar_lea.hbm %s1071_s2, 2048 }
 0x128   : > { %p716_p3 = scmp.ne.s32.totalorder %s1021_s4, %s715_s29  ;;  %p720_p12 = scmp.lt.s32.totalorder %s1021_s4, %s1071_s2 }
 0x129   : > { %p721_p7 = scmp.lt.s32.totalorder %s719_s16, %s715_s29 }
 0x12a   : > { %p717_p5 = pnand %p716_p3, %p1088_p1 }
 0x12b   : > { %p722_p6 = por %p721_p7, %p720_p12 }
 0x12c   : > { %p718_p11 = pneg %p717_p5 }
 0x12e   : > { %p723_p13 = pnand %p722_p6, %p718_p11 }
 0x130   : > { %726 = shalt.err (!%p723_p13)
}
 0x131   : > { %s778_s5 = smov 256   ;;  %s779_s8 = smov 16  }
 0x132   : > { %584 = dma.vmem_to_hbm [thread:$0]  (%p1088_p1), %s1023_s19, 1024, %s1021_s4, %s373_s13, %s778_s5, %s778_s5, %s779_s8  }
 0x133 PF: > { %s402_s20 = sand.u32 1, %s757_s9   ;;  %p1089_p9 = scmp.ne.s32.totalorder %s1077_s22, 0 }
 0x134   : > { %p1090_p8 = scmp.ge.s32.totalorder %s769_s12, 2  ;;  %s403_s17 = scalar_lea.sflag [#allocation4], %s402_s20 }
 0x136   : > { %p594_p10 = pnand %p1090_p8, %p1089_p9 }
 0x138   : > { %p595_p0 = pneg %p594_p10 }
 0x13a   : > { %752 = dma.done.wait (%p595_p0), %s403_s17, 1024  }
 0x13b   : > { %754 = vsyncadd (%p595_p0), %s403_s17, 4294966272  ;;  %p18_p2 = scmp.ge.s32.totalorder %s820_s15, 4   ;;  %s1091_s9 = smov %s761_s10 }
 0x13c   : > { %s1092_s10 = smov %s765_s11  ;;  %s1093_s11 = smov %s832_s18 }
 0x13d   : > { %s1094_s12 = smov %s820_s15  ;;  %20 = sbr.rel (!%p18_p2) target bundleno = 7 (0x7), region = 86 }
 0x142   :  { %408 = vsyncpa [#allocation3], 1 }
 0x143   :  { %410 = vsyncpa [#allocation3 + $0x1], 1 }
 0x144   :  { %411 = vsyncpa [#allocation6], 1 }
 0x145   :  { %413 = vsyncpa [#allocation6 + $0x1], 1 }
 0x146   :  { %414 = vsyncpa [#allocation4], 1 }
 0x147   :  { %416 = vsyncpa [#allocation4 + $0x1], 1 }

</bundles_post_ra>
